<compile_context>
chip_gen: v7x
topology: tpu7x:2x2x1
jax: 0.10.0
libtpu: 0.0.40
codegen_flags: <defaults>
</compile_context>

<pallas_src>
import functools

import jax
import jax.numpy as jnp
import numpy as np
from jax.experimental import pallas as pl
from jax.experimental.pallas import tpu as pltpu


# --------------------------------- helpers ---------------------------------

def _round_up(x, m):
    return ((x + m - 1) // m) * m


def _cdiv(a, b):
    return -(-a // b)


def _vmem_budget():
    """Per-TensorCore VMEM budget (bytes) we allow a kernel's working set to use.

    Queried from the device so v5e/v6e (128 MiB) get bigger tiles than v7x
    (64 MiB per core); falls back to a v7x-safe value if the query fails.
    """
    cap = None
    try:
        cap = getattr(pltpu.get_tpu_info(), "vmem_capacity_bytes", None)
    except Exception:
        cap = None
    if not isinstance(cap, (int, np.integer)) or cap <= 0:
        cap = 64 * 1024 * 1024
    return int(int(cap) * 0.7)           # leave headroom for compiler scratch


_M_TILE_CANDIDATES = (2048, 1024, 512, 256, 128, 64, 32, 16, 8)


def _pick_m_tile(m_rows, row_bytes, fixed_bytes, budget_bytes):
    """Largest sublane (second-minor) tile that fits the VMEM budget and, when
    possible, keeps the 1-D grid at >= 2 steps (so both v7x TensorCores get work
    under dimension_semantics=('parallel',))."""
    if m_rows < 8:
        return m_rows                      # block must equal the full (small) dim
    feasible = [c for c in _M_TILE_CANDIDATES
                if fixed_bytes + c * row_bytes <= budget_bytes]
    if not feasible:
        feasible = [8]
    for c in feasible:                     # descending -> largest with >=2 steps
        if _cdiv(m_rows, c) >= 2:
            return c
    return feasible[-1]


def _pick_tile(dim, candidates):
    """Pick the tile from `candidates` minimizing padding; prefer larger on ties."""
    best_tile, best_pad = None, None
    for c in candidates:
        padded = _round_up(dim, c)
        if best_pad is None or padded < best_pad or (padded == best_pad and c > best_tile):
            best_tile, best_pad = c, padded
    return best_tile, best_pad


# ----------------------------- avg_pool2d(2, stride=2) -----------------------------

def _avg_pool_kernel(x_ref, p_ref, o_ref):
    # x_ref: (tm, g*2W)  -- g row-groups, each = two input rows concatenated.
    # p_ref: (g*2W, g*OW) block-diagonal 0.25 pooling matrix (folds H pair-add + W pool).
    # o_ref: (tm, g*OW)  -- lane-dense (>=128 wide whenever divisibility allows).
    o_ref[...] = jnp.dot(x_ref[...], p_ref[...],
                         preferred_element_type=jnp.float32).astype(o_ref.dtype)


@functools.lru_cache(maxsize=None)
def _pool_matrix_np(width, groups):
    """Block-diagonal pooling matrix as numpy (host); cast to device dtype per call."""
    ow = width // 2
    base = np.zeros((2 * width, ow), np.float32)
    idx = np.arange(2 * width)
    base[idx, (idx % width) // 2] = 0.25
    p = np.zeros((groups * 2 * width, groups * ow), np.float32)
    for j in range(groups):
        p[j * 2 * width:(j + 1) * 2 * width, j * ow:(j + 1) * ow] = base
    return p


def avg_pool_2x2(x):
    """Equivalent of F.avg_pool2d(x, 2, stride=2) on NCHW input (floors odd dims)."""
    B, C, H, W = x.shape
    OH, OW = H // 2, W // 2
    if OH == 0 or OW == 0:
        return jnp.zeros((B, C, OH, OW), x.dtype)
    if (H % 2) or (W % 2):                         # PyTorch floor semantics
        x = x[:, :, :2 * OH, :2 * OW]
        H, W = 2 * OH, 2 * OW

    M = B * C * OH

    # Lane-dense packing: fold g output rows into one kernel row so the output
    # last dim is >= 128 (unmasked vector stores on all generations, mandatory
    # on v5e's single vst slot).  g must divide M (reshape stays free).
    target_g = _cdiv(128, OW) if OW < 128 else 1
    g = 1
    for cand in range(min(target_g, M), 1, -1):
        if M % cand == 0:
            g = cand
            break
    Mg = M // g

    # (B, C, H, W) -> (Mg, g*2W): pure row-major reshape (free).
    x2 = x.reshape(Mg, g * 2 * W)
    pool_mat = jnp.asarray(_pool_matrix_np(W, g), dtype=x.dtype)   # 0.25 exact in bf16

    item = jnp.dtype(x.dtype).itemsize
    row_bytes = 2 * (g * 2 * W + g * OW) * item                    # double-buffered in+out
    fixed_bytes = 2 * (g * 2 * W) * (g * OW) * item                # pooling matrix
    budget = _vmem_budget()

    tm = _pick_m_tile(Mg, row_bytes, fixed_bytes, budget)
    grid_m = _cdiv(Mg, tm)                                         # ragged last tile is masked

    out = pl.pallas_call(
        _avg_pool_kernel,
        out_shape=jax.ShapeDtypeStruct((Mg, g * OW), x.dtype),
        grid_spec=pltpu.PrefetchScalarGridSpec(
            num_scalar_prefetch=0,
            grid=(grid_m,),
            in_specs=[
                pl.BlockSpec((tm, g * 2 * W), lambda i: (i, 0)),
                pl.BlockSpec((g * 2 * W, g * OW), lambda i: (0, 0)),
            ],
            out_specs=pl.BlockSpec((tm, g * OW), lambda i: (i, 0)),
        ),
        compiler_params=pltpu.CompilerParams(
            dimension_semantics=("parallel",),
            vmem_limit_bytes=budget,
        ),
        cost_estimate=pl.CostEstimate(
            flops=2 * Mg * (g * 2 * W) * (g * OW),
            transcendentals=0,
            bytes_accessed=(Mg * g * 2 * W + (g * 2 * W) * (g * OW) + Mg * g * OW) * item,
        ),
    )(x2, pool_mat)

    return out.reshape(B, C, OH, OW)


# ----------------------- pad(0,1,0,1) + conv3x3 stride-2 (with_conv) -----------------------

def _conv_resident_kernel(p_ref, w_ref, b_ref, o_ref):
    # Weight-resident path: full-K, full-N matmul per M tile; no accumulator phases.
    o_ref[...] = (jnp.dot(p_ref[...], w_ref[...], preferred_element_type=jnp.float32)
                  + b_ref[...]).astype(o_ref.dtype)


def _conv_tiled_kernel(p_ref, w_ref, b_ref, o_ref, acc_ref):
    # Fallback for weights too large for VMEM: K-reduction grid axis + f32 accumulator.
    k = pl.program_id(2)

    @pl.when(k == 0)
    def _():
        acc_ref[...] = jnp.zeros_like(acc_ref)

    acc_ref[...] += jnp.dot(p_ref[...], w_ref[...], preferred_element_type=jnp.float32)

    @pl.when(k == pl.num_programs(2) - 1)
    def _():
        o_ref[...] = (acc_ref[...] + b_ref[...]).astype(o_ref.dtype)


def conv3x3_stride2_asym_pad(x, weight, bias, *, compute_dtype=None):
    """x: (B, C, H, W); weight: (out_ch, C, 3, 3); bias: (out_ch,).  NCHW in/out.

    compute_dtype=jnp.bfloat16 casts the matmul operands (f32 accumulation kept)
    for the MXU-native path on v6e/v7x; default None keeps exact f32.
    """
    B, C, H, W = x.shape
    OC = weight.shape[0]
    OH, OW = H // 2, W // 2
    M, N = B * OH * OW, OC
    K_raw = 9 * C
    K = _round_up(K_raw, 8)          # keep contraction dim sublane-aligned (zero tap)

    # --- im2col in NHWC (no 5-D transpose of the 9x-expanded tensor) ---
    # TODO(synk): fuse the im2col into the Pallas kernel (tap assembly from the padded
    # NHWC activation via manual DMA / memory_space=pl.ANY) to remove the materialized
    # 2.25x patches tensor from HBM entirely.
    # TODO(synk): if the surrounding model runs NHWC end-to-end, drop the two boundary
    # transposes below (each is a full HBM round trip of the activation).
    xh = jnp.transpose(x, (0, 2, 3, 1))                       # (B, H, W, C)
    xp = jnp.pad(xh, ((0, 0), (0, 1), (0, 1), (0, 0)))        # F.pad(x, (0,1,0,1))
    taps = [xp[:, kh:kh + 2 * OH:2, kw:kw + 2 * OW:2, :]
            for kh in range(3) for kw in range(3)]            # 9 x (B, OH, OW, C)
    if K != K_raw:
        taps.append(jnp.zeros((B, OH, OW, K - K_raw), x.dtype))
    patches = jnp.concatenate(taps, axis=-1).reshape(M, K)    # (kh,kw)-major, c-minor

    wmat = jnp.transpose(weight, (2, 3, 1, 0)).reshape(K_raw, N)   # matching K ordering
    if K != K_raw:
        wmat = jnp.pad(wmat, ((0, K - K_raw), (0, 0)))
    bvec = bias.reshape(1, N).astype(jnp.float32)

    if compute_dtype is not None:
        patches = patches.astype(compute_dtype)
        wmat = wmat.astype(compute_dtype)

    in_item = jnp.dtype(patches.dtype).itemsize
    w_item = jnp.dtype(wmat.dtype).itemsize
    out_item = jnp.dtype(x.dtype).itemsize

    Np = max(128, _round_up(N, 128))          # lane-dense, MXU-aligned output width
    budget = _vmem_budget()

    resident_fixed = 2 * K * Np * w_item + 2 * Np * 4           # weight + bias (dbuf)
    resident_row = 2 * (K * in_item + Np * out_item)            # patches + out per row (dbuf)

    if resident_fixed + 8 * resident_row <= budget:
        # ---- weight-resident single-matmul path: 1-D grid over M only ----
        if Np != N:
            wmat = jnp.pad(wmat, ((0, 0), (0, Np - N)))
            bvec = jnp.pad(bvec, ((0, 0), (0, Np - N)))
        tm = _pick_m_tile(M, resident_row, resident_fixed, budget)
        grid_m = _cdiv(M, tm)                                   # ragged last tile masked

        out = pl.pallas_call(
            _conv_resident_kernel,
            out_shape=jax.ShapeDtypeStruct((M, Np), x.dtype),
            grid_spec=pltpu.PrefetchScalarGridSpec(
                num_scalar_prefetch=0,
                grid=(grid_m,),
                in_specs=[
                    pl.BlockSpec((tm, K), lambda i: (i, 0)),
                    pl.BlockSpec((K, Np), lambda i: (0, 0)),    # stays VMEM-resident
                    pl.BlockSpec((1, Np), lambda i: (0, 0)),
                ],
                out_specs=pl.BlockSpec((tm, Np), lambda i: (i, 0)),
            ),
            compiler_params=pltpu.CompilerParams(
                dimension_semantics=("parallel",),
                vmem_limit_bytes=budget,
            ),
            cost_estimate=pl.CostEstimate(
                flops=2 * M * K * Np,
                transcendentals=0,
                bytes_accessed=M * K * in_item + K * Np * w_item + M * Np * out_item + Np * 4,
            ),
        )(patches, wmat, bvec)
    else:
        # ---- fallback (very large channel counts): tiled matmul, K-reduction last ----
        tm, Mp = _pick_tile(M, (1024, 512, 256, 128, 64, 32, 16, 8))
        tk, Kp = _pick_tile(K, (512, 384, 256, 128))
        tn, Npt = _pick_tile(N, (512, 256, 128))
        if (Mp, Kp) != (M, K):
            patches = jnp.pad(patches, ((0, Mp - M), (0, Kp - K)))
        if (Kp, Npt) != (K, N):
            wmat = jnp.pad(wmat, ((0, Kp - K), (0, Npt - N)))
        if Npt != N:
            bvec = jnp.pad(bvec, ((0, 0), (0, Npt - N)))

        out = pl.pallas_call(
            _conv_tiled_kernel,
            out_shape=jax.ShapeDtypeStruct((Mp, Npt), x.dtype),
            grid_spec=pltpu.PrefetchScalarGridSpec(
                num_scalar_prefetch=0,
                grid=(Mp // tm, Npt // tn, Kp // tk),           # K-reduction axis last
                in_specs=[
                    pl.BlockSpec((tm, tk), lambda i, j, k: (i, k)),
                    pl.BlockSpec((tk, tn), lambda i, j, k: (k, j)),
                    pl.BlockSpec((1, tn), lambda i, j, k: (0, j)),
                ],
                out_specs=pl.BlockSpec((tm, tn), lambda i, j, k: (i, j)),
                scratch_shapes=[pltpu.VMEM((tm, tn), jnp.float32)],
            ),
            compiler_params=pltpu.CompilerParams(
                dimension_semantics=("parallel", "parallel", "arbitrary"),
                vmem_limit_bytes=budget,
            ),
            cost_estimate=pl.CostEstimate(
                flops=2 * Mp * Kp * Npt,
                transcendentals=0,
                bytes_accessed=(Mp * Kp * in_item + Kp * Npt * w_item
                                + Mp * Npt * out_item + Npt * 4),
            ),
        )(patches, wmat, bvec)

    out = out[:M, :N].reshape(B, OH, OW, OC)
    # NCHW module boundary (matches the PyTorch reference).
    return jnp.transpose(out, (0, 3, 1, 2))


# ----------------------------------- module wrapper -----------------------------------

class DownsampleppPallas:
    """JAX/Pallas port of Downsamplepp (fir=False branches)."""

    def __init__(self, in_ch=None, out_ch=None, with_conv=False, fir=False,
                 fir_kernel=(1, 3, 3, 1), key=None, compute_dtype=None):
        out_ch = out_ch if out_ch else in_ch
        self.fir = fir
        self.with_conv = with_conv
        self.fir_kernel = fir_kernel
        self.out_ch = out_ch
        self.compute_dtype = compute_dtype     # e.g. jnp.bfloat16 on v6e/v7x
        if fir:
            # TODO(synk): fir branch depends on up_or_down_sampling.* which is not in the provided source.
            raise NotImplementedError("fir=True branch not available")
        if with_conv:
            # DDPM default_initializer(1.0) = variance_scaling(1, 'fan_avg', 'uniform'); zero bias.
            key = jax.random.PRNGKey(42) if key is None else key
            shape = (out_ch, in_ch, 3, 3)
            fan_in, fan_out = in_ch * 9, out_ch * 9
            variance = 1.0 / ((fan_in + fan_out) / 2.0)
            limit = float((3.0 * variance) ** 0.5)
            self.weight = jax.random.uniform(key, shape, jnp.float32, -limit, limit)
            self.bias = jnp.zeros((out_ch,), jnp.float32)

    def __call__(self, x):
        if self.with_conv:
            return conv3x3_stride2_asym_pad(x, self.weight, self.bias,
                                            compute_dtype=self.compute_dtype)
        return avg_pool_2x2(x)


# ----------------------------------------- main -----------------------------------------

if __name__ == "__main__":
    B, C, H, W = 2, 4, 16, 16
    x = jax.random.normal(jax.random.PRNGKey(0), (B, C, H, W), jnp.float32)

    # Branch 1: default (with_conv=False, fir=False) -> avg_pool2d(2, stride=2)
    mod_pool = DownsampleppPallas(in_ch=C)
    y_pool = jax.block_until_ready(mod_pool(x))
    ref_pool = x.reshape(B, C, H // 2, 2, W // 2, 2).mean(axis=(3, 5))
    assert y_pool.shape == (B, C, H // 2, W // 2)
    assert jnp.allclose(y_pool, ref_pool, atol=1e-5), "avg-pool mismatch"

    # bf16 input exercises the bf16 pooling-matrix / bf16-MXU path.
    y_pool_bf16 = jax.block_until_ready(mod_pool(x.astype(jnp.bfloat16)))
    assert jnp.allclose(y_pool_bf16.astype(jnp.float32), ref_pool, atol=2e-2), \
        "bf16 avg-pool mismatch"

    # Odd spatial dims: PyTorch avg_pool2d floors; kernel must match the cropped ref.
    x_odd = x[:, :, :15, :15]
    y_odd = jax.block_until_ready(avg_pool_2x2(x_odd))
    ref_odd = x_odd[:, :, :14, :14].reshape(B, C, 7, 2, 7, 2).mean(axis=(3, 5))
    assert y_odd.shape == (B, C, 7, 7)
    assert jnp.allclose(y_odd, ref_odd, atol=1e-5), "odd-dim avg-pool mismatch"

    # Branch 2: with_conv=True, fir=False -> pad(0,1,0,1) + conv3x3 stride 2
    out_ch = 8
    mod_conv = DownsampleppPallas(in_ch=C, out_ch=out_ch, with_conv=True)
    y_conv = jax.block_until_ready(mod_conv(x))
    xp = jnp.pad(x, ((0, 0), (0, 0), (0, 1), (0, 1)))
    ref_conv = jax.lax.conv_general_dilated(
        xp, mod_conv.weight, window_strides=(2, 2), padding="VALID",
        dimension_numbers=("NCHW", "OIHW", "NCHW")) + mod_conv.bias.reshape(1, out_ch, 1, 1)
    assert y_conv.shape == (B, out_ch, H // 2, W // 2)
    assert jnp.allclose(y_conv, ref_conv, atol=1e-4), "conv mismatch"

    print("KERNEL_OK")
</pallas_src>

<mosaic_0001>
module attributes {stable_mosaic.version = 11 : i64} {
  func.func @_avg_pool_kernel(%arg0: i32, %arg1: memref<4x512xf32, #tpu.memory_space<vmem>>, %arg2: memref<512x128xf32, #tpu.memory_space<vmem>>, %arg3: memref<4x128xf32, #tpu.memory_space<vmem>>) attributes {dimension_semantics = [#tpu.dimension_semantics<parallel>], iteration_bounds = array<i64: 1>, scalar_prefetch = 0 : i64, scratch_operands = 0 : i64, tpu.core_type = #tpu.core_type<tc>, window_params = [{transform_indices = @transform_0, window_bounds = array<i64: 4, 512>}, {pipeline_mode = #tpu.pipeline_mode<synchronous>, transform_indices = @transform_1, window_bounds = array<i64: 512, 128>}, {transform_indices = @transform_2, window_bounds = array<i64: 4, 128>}]} {
    %c0 = arith.constant 0 : index
    %c0_0 = arith.constant 0 : index
    %0 = vector.load %arg1[%c0, %c0_0] : memref<4x512xf32, #tpu.memory_space<vmem>>, vector<4x512xf32>
    %c0_1 = arith.constant 0 : index
    %c0_2 = arith.constant 0 : index
    %1 = vector.load %arg2[%c0_1, %c0_2] : memref<512x128xf32, #tpu.memory_space<vmem>>, vector<512x128xf32>
    %cst = arith.constant dense<0.000000e+00> : vector<4x128xf32>
    %2 = tpu.matmul %0, %1, %cst {dimension_numbers = #tpu.dot_dimension_numbers<[1], [0], [0], [1], [0, 0, 1, 1], [], []>} : vector<4x512xf32>, vector<512x128xf32>, vector<4x128xf32> -> vector<4x128xf32>
    %c0_3 = arith.constant 0 : index
    %c0_4 = arith.constant 0 : index
    %3 = vector.load %arg3[%c0_3, %c0_4] : memref<4x128xf32, #tpu.memory_space<vmem>>, vector<4x128xf32>
    tpu.vector_store %arg3[%c0_3, %c0_4], %2 {strides = array<i32>} : memref<4x128xf32, #tpu.memory_space<vmem>>, vector<4x128xf32>,
    return
  }
  func.func @transform_0(%arg0: i32) -> (i32, i32) {
    %c0_i32 = arith.constant 0 : i32
    %c0_i32_0 = arith.constant 0 : i32
    return %arg0, %c0_i32 : i32, i32
  }
  func.func @transform_1(%arg0: i32) -> (i32, i32) {
    %c0_i32 = arith.constant 0 : i32
    %c0_i32_0 = arith.constant 0 : i32
    %c0_i32_1 = arith.constant 0 : i32
    return %c0_i32, %c0_i32_0 : i32, i32
  }
  func.func @transform_2(%arg0: i32) -> (i32, i32) {
    %c0_i32 = arith.constant 0 : i32
    %c0_i32_0 = arith.constant 0 : i32
    return %arg0, %c0_i32 : i32, i32
  }
}

</mosaic_0001>

<bundles_post_ra>
// kernel: tpu_custom_call.1
= control target key start
LH: loop header
LB: loop body
LE: loop exit
PB: predicated region body
PF: predicated region fallthrough
CT: control target
= control target key end

     0   :  { %7 = vsyncpa [#allocation3], 0  ;;  %s543_s0 = inlined_call_operand.hbm [shape: f32[4,512], index: 0, kind: input, shape index: {}]   ;;  %s544_s1 = inlined_call_operand.hbm [shape: f32[512,128], index: 1, kind: input, shape index: {}]   ;;  %s545_s2 = inlined_call_operand.hbm [shape: f32[4,128], index: 2, kind: output, shape index: {}]  }
   0x1   :  { %8 = vsyncpa [#allocation6], 0 }
   0x2   :  { %9 = vsyncpa [#allocation4], 0  ;;  %s480_s9 = smov [#allocation2]   ;;  %s481_s11 = smov [#allocation5]  }
   0x3   :  { %s16_s10 = sshll.u32 %s480_s9, 4  ;;  %s25_s12 = sshll.u32 %s481_s11, 4  ;;  %s17_s10 = int_to_ptr.vmem [resolvable:$true] %s16_s10  ;;  %s500_s12 = int_to_ptr.vmem [resolvable:$true] %s25_s12 }
   0x4   :  { %s408_s15 = scalar_lea.hbm %s543_s0, 256 }
   0x5   :  { %p409_p0 = scmp.ne.s32.totalorder %s543_s0, %s408_s15  ;;  %p412_p1 = scmp.lt.u32.totalorder %s408_s15, %s543_s0 }
   0x7   :  { %p414_p2 = pnand %p412_p1, %p409_p0 }
   0x9   :  { %417 = shalt.err (!%p414_p2)
}
   0xa   :  { %s418_s20 = scalar_lea.vmem %s17_s10, 256  ;;  %p423_p4 = scmp.lt.s32.totalorder %s17_s10, %s17_s10 }
   0xb   :  { %p419_p3 = scmp.ne.s32.totalorder %s17_s10, %s418_s20  ;;  %p424_p5 = scmp.lt.s32.totalorder %s418_s20, %s418_s20 }
   0xd   :  { %p425_p6 = por %p424_p5, %p423_p4 }
   0xf   :  { %p426_p7 = pnand %p425_p6, %p419_p3 }
  0x11   :  { %429 = shalt.err (!%p426_p7)
}
  0x12   :  { %19 = dma.hbm_to_vmem [thread:$0]  %s543_s0, 256, %s17_s10, [#allocation3]  }
  0x13   :  { %s430_s25 = scalar_lea.hbm %s544_s1, 8192 }
  0x14   :  { %p431_p8 = scmp.ne.s32.totalorder %s544_s1, %s430_s25  ;;  %p434_p9 = scmp.lt.u32.totalorder %s430_s25, %s544_s1 }
  0x16   :  { %p436_p10 = pnand %p434_p9, %p431_p8 }
  0x18   :  { %439 = shalt.err (!%p436_p10)
}
  0x19   :  { %s440_s30 = scalar_lea.vmem %s500_s12, 8192  ;;  %p445_p12 = scmp.lt.s32.totalorder %s500_s12, %s500_s12 }
  0x1a   :  { %p441_p11 = scmp.ne.s32.totalorder %s500_s12, %s440_s30  ;;  %p446_p13 = scmp.lt.s32.totalorder %s440_s30, %s440_s30 }
  0x1c   :  { %p447_p0 = por %p446_p13, %p445_p12 }
  0x1e   :  { %p448_p1 = pnand %p447_p0, %p441_p11 }
  0x20   :  { %451 = shalt.err (!%p448_p1)
}
  0x21   :  { %s482_s0 = smov 128   ;;  %s483_s3 = smov 8  }
  0x22   :  { %31 = dma.hbm_to_vmem [thread:$0]  %s544_s1, 8192, %s500_s12, [#allocation6], %s482_s0, %s482_s0, %s483_s3  }
  0x23   :  { %474 = dma.done.wait [#allocation3], 256  }
  0x24   :  { %475 = vsyncadd [#allocation3], 4294967040 }
  0x25   :  { %476 = dma.done.wait [#allocation6], 8192  }
  0x26   :  { %477 = vsyncadd [#allocation6], 4294959104  ;;  %v56_v0 = vld [vmem:[#allocation5 + $0x80] sm:$0xff]  ;;  %v57_v1 = vld [vmem:[#allocation5 + $0x88] sm:$0xff]  ;;  %s484_s1 = smov [#allocation7]  }
  0x27   :  { %v88_v2 = vld [vmem:[#allocation5 + $0x180] sm:$0xff]  ;;  %v337_v3 = vpack.c.bf16 %v57_v1, %v56_v0  ;;  %v89_v4 = vld [vmem:[#allocation5 + $0x188] sm:$0xff]  ;;  %v58_v11 = vld [vmem:[#allocation5 + $0x90] sm:$0xff]  ;;  %s257_s6 = sshll.u32 %s484_s1, 4  ;;  %s258_s6 = int_to_ptr.vmem [resolvable:$true] %s257_s6 }
  0x28   :  { %v40_v5 = vld [vmem:[#allocation5] sm:$0xff]  ;;  %v41_v6 = vld [vmem:[#allocation5 + $0x8] sm:$0xff]  ;;  %v369_v7 = vpack.c.bf16 %v89_v4, %v88_v2  ;;  %v59_v13 = vld [vmem:[#allocation5 + $0x98] sm:$0xff]  ;;  %s452_s7 = scalar_lea.vmem %s258_s6, 64  ;;  %p457_p3 = scmp.lt.s32.totalorder %s258_s6, %s258_s6 }
  0x29   :  { %v339_v8 = vpack.c.bf16 %v41_v6, %v40_v5  ;;  %v72_v9 = vld [vmem:[#allocation5 + $0x100] sm:$0xff]  ;;  %v73_v10 = vld [vmem:[#allocation5 + $0x108] sm:$0xff]  ;;  %338 = vmatprep.subr.bf16.mxu0 %v337_v3  ;;  %v90_v14 = vld [vmem:[#allocation5 + $0x190] sm:$0xff]  ;;  %v341_v16 = vpack.c.bf16 %v59_v13, %v58_v11  ;;  %p453_p2 = scmp.ne.s32.totalorder %s258_s6, %s452_s7  ;;  %p458_p4 = scmp.lt.s32.totalorder %s452_s7, %s452_s7 }
  0x2a   :  { %v371_v12 = vpack.c.bf16 %v73_v10, %v72_v9  ;;  %v91_v15 = vld [vmem:[#allocation5 + $0x198] sm:$0xff]  ;;  %370 = vmatprep.subr.bf16.mxu1 %v369_v7  ;;  %v42_v18 = vld [vmem:[#allocation5 + $0x10] sm:$0xff]  ;;  %v60_v23 = vld [vmem:[#allocation5 + $0xa0] sm:$0xff] }
  0x2b   :  { %340 = vmatpush3.bf16.msra.mxu0 %v339_v8  ;;  %v373_v17 = vpack.c.bf16 %v91_v15, %v90_v14  ;;  %v43_v19 = vld [vmem:[#allocation5 + $0x18] sm:$0xff]  ;;  %v74_v20 = vld [vmem:[#allocation5 + $0x110] sm:$0xff]  ;;  %v61_v24 = vld [vmem:[#allocation5 + $0xa8] sm:$0xff]  ;;  %p459_p5 = por %p458_p4, %p457_p3 }
  0x2c   :  { %372 = vmatpush3.bf16.msra.mxu1 %v371_v12  ;;  %v343_v21 = vpack.c.bf16 %v43_v19, %v42_v18  ;;  %v75_v22 = vld [vmem:[#allocation5 + $0x118] sm:$0xff]  ;;  %342 = vmatprep.subr.bf16.mxu0 %v341_v16  ;;  %v345_v26 = vpack.c.bf16 %v61_v24, %v60_v23  ;;  %v92_v27 = vld [vmem:[#allocation5 + $0x1a0] sm:$0xff]  ;;  %v93_v28 = vld [vmem:[#allocation5 + $0x1a8] sm:$0xff] }
  0x2d   :  { %374 = vmatprep.subr.bf16.mxu1 %v373_v17  ;;  %v375_v25 = vpack.c.bf16 %v75_v22, %v74_v20  ;;  %v44_v29 = vld [vmem:[#allocation5 + $0x20] sm:$0xff]  ;;  %v377_v30 = vpack.c.bf16 %v93_v28, %v92_v27  ;;  %v45_v31 = vld [vmem:[#allocation5 + $0x28] sm:$0xff]  ;;  %v62_v35 = vld [vmem:[#allocation5 + $0xb0] sm:$0xff]  ;;  %p460_p6 = pnand %p459_p5, %p453_p2 }
  0x2e   :  { %v76_v32 = vld [vmem:[#allocation5 + $0x120] sm:$0xff]  ;;  %v77_v33 = vld [vmem:[#allocation5 + $0x128] sm:$0xff]  ;;  %v347_v34 = vpack.c.bf16 %v45_v31, %v44_v29  ;;  %v63_v36 = vld [vmem:[#allocation5 + $0xb8] sm:$0xff] }
  0x2f   :  { %344 = vmatpush3.bf16.msra.mxu0 %v343_v21  ;;  %v94_v37 = vld [vmem:[#allocation5 + $0x1b0] sm:$0xff]  ;;  %v379_v38 = vpack.c.bf16 %v77_v33, %v76_v32  ;;  %v349_v39 = vpack.c.bf16 %v63_v36, %v62_v35  ;;  %v95_v40 = vld [vmem:[#allocation5 + $0x1b8] sm:$0xff]  ;;  %v64_v46 = vld [vmem:[#allocation5 + $0xc0] sm:$0xff] }
  0x30   :  { %376 = vmatpush3.bf16.msra.mxu1 %v375_v25  ;;  %346 = vmatprep.subr.bf16.mxu0 %v345_v26  ;;  %v46_v41 = vld [vmem:[#allocation5 + $0x30] sm:$0xff]  ;;  %v47_v42 = vld [vmem:[#allocation5 + $0x38] sm:$0xff]  ;;  %v381_v43 = vpack.c.bf16 %v95_v40, %v94_v37  ;;  %v65_v47 = vld [vmem:[#allocation5 + $0xc8] sm:$0xff] }
  0x31   :  { %378 = vmatprep.subr.bf16.mxu1 %v377_v30  ;;  %v78_v44 = vld [vmem:[#allocation5 + $0x130] sm:$0xff]  ;;  %v79_v45 = vld [vmem:[#allocation5 + $0x138] sm:$0xff]  ;;  %v96_v48 = vld [vmem:[#allocation5 + $0x1c0] sm:$0xff]  ;;  %v351_v50 = vpack.c.bf16 %v47_v42, %v46_v41  ;;  %v353_v52 = vpack.c.bf16 %v65_v47, %v64_v46 }
  0x32   :  { %v97_v49 = vld [vmem:[#allocation5 + $0x1c8] sm:$0xff]  ;;  %v383_v51 = vpack.c.bf16 %v79_v45, %v78_v44  ;;  %v48_v53 = vld [vmem:[#allocation5 + $0x40] sm:$0xff]  ;;  %v66_v58 = vld [vmem:[#allocation5 + $0xd0] sm:$0xff] }
  0x33   :  { %348 = vmatpush3.bf16.msra.mxu0 %v347_v34  ;;  %v49_v54 = vld [vmem:[#allocation5 + $0x48] sm:$0xff]  ;;  %v80_v55 = vld [vmem:[#allocation5 + $0x140] sm:$0xff]  ;;  %v385_v56 = vpack.c.bf16 %v97_v49, %v96_v48  ;;  %v67_v59 = vld [vmem:[#allocation5 + $0xd8] sm:$0xff] }
  0x34   :  { %380 = vmatpush3.bf16.msra.mxu1 %v379_v38  ;;  %350 = vmatprep.subr.bf16.mxu0 %v349_v39  ;;  %v81_v57 = vld [vmem:[#allocation5 + $0x148] sm:$0xff]  ;;  %v98_v60 = vld [vmem:[#allocation5 + $0x1d0] sm:$0xff]  ;;  %v99_v61 = vld [vmem:[#allocation5 + $0x1d8] sm:$0xff]  ;;  %v355_v62 = vpack.c.bf16 %v49_v54, %v48_v53  ;;  %v357_v0 = vpack.c.bf16 %v67_v59, %v66_v58 }
  0x35   :  { %382 = vmatprep.subr.bf16.mxu1 %v381_v43  ;;  %v387_v63 = vpack.c.bf16 %v81_v57, %v80_v55  ;;  %v50_v1 = vld [vmem:[#allocation5 + $0x50] sm:$0xff]  ;;  %v51_v2 = vld [vmem:[#allocation5 + $0x58] sm:$0xff]  ;;  %v389_v4 = vpack.c.bf16 %v99_v61, %v98_v60  ;;  %v68_v6 = vld [vmem:[#allocation5 + $0xe0] sm:$0xff] }
  0x36   :  { %v82_v3 = vld [vmem:[#allocation5 + $0x150] sm:$0xff]  ;;  %v83_v5 = vld [vmem:[#allocation5 + $0x158] sm:$0xff]  ;;  %v69_v7 = vld [vmem:[#allocation5 + $0xe8] sm:$0xff]  ;;  %v359_v10 = vpack.c.bf16 %v51_v2, %v50_v1 }
  0x37   :  { %352 = vmatpush3.bf16.msra.mxu0 %v351_v50  ;;  %v100_v8 = vld [vmem:[#allocation5 + $0x1e0] sm:$0xff]  ;;  %v101_v9 = vld [vmem:[#allocation5 + $0x1e8] sm:$0xff]  ;;  %v391_v13 = vpack.c.bf16 %v83_v5, %v82_v3  ;;  %v361_v14 = vpack.c.bf16 %v69_v7, %v68_v6  ;;  %v38_v16 = vld [vmem:[#allocation2] sm:$0xff] }
  0x38   :  { %384 = vmatpush3.bf16.msra.mxu1 %v383_v51  ;;  %354 = vmatprep.subr.bf16.mxu0 %v353_v52  ;;  %v52_v11 = vld [vmem:[#allocation5 + $0x60] sm:$0xff]  ;;  %v53_v12 = vld [vmem:[#allocation5 + $0x68] sm:$0xff]  ;;  %v39_v17 = vld [vmem:[#allocation2 + $0x8] sm:$0xff]  ;;  %v393_v18 = vpack.c.bf16 %v101_v9, %v100_v8  ;;  %v106_v22 = vcombine.high %v38_v16, %v38_v16 }
  0x39   :  { %386 = vmatprep.subr.bf16.mxu1 %v385_v56  ;;  %v84_v15 = vld [vmem:[#allocation5 + $0x160] sm:$0xff]  ;;  %v85_v19 = vld [vmem:[#allocation5 + $0x168] sm:$0xff]  ;;  %v70_v20 = vld [vmem:[#allocation5 + $0xf0] sm:$0xff]  ;;  %v107_v23 = vcombine.high %v39_v17, %v39_v17  ;;  %v363_v26 = vpack.c.bf16 %v53_v12, %v52_v11 }
  0x3a   :  { %v71_v21 = vld [vmem:[#allocation5 + $0xf8] sm:$0xff]  ;;  %v102_v24 = vld [vmem:[#allocation5 + $0x1f0] sm:$0xff]  ;;  %174 = vmatprep.mubr.f32.mxu0 %v106_v22  ;;  %v395_v27 = vpack.c.bf16 %v85_v19, %v84_v15 }
  0x3b   :  { %356 = vmatpush3.bf16.msra.mxu0 %v355_v62  ;;  %v103_v25 = vld [vmem:[#allocation5 + $0x1f8] sm:$0xff]  ;;  %v365_v28 = vpack.c.bf16 %v71_v21, %v70_v20  ;;  %v54_v29 = vld [vmem:[#allocation5 + $0x70] sm:$0xff]  ;;  %244 = vmatprep.mubr.f32.mxu1 %v107_v23 }
  0x3c   :  { %388 = vmatpush3.bf16.msra.mxu1 %v387_v63  ;;  %358 = vmatprep.subr.bf16.mxu0 %v357_v0  ;;  %v55_v30 = vld [vmem:[#allocation5 + $0x78] sm:$0xff]  ;;  %v397_v31 = vpack.c.bf16 %v103_v25, %v102_v24  ;;  %v86_v32 = vld [vmem:[#allocation5 + $0x170] sm:$0xff] }
  0x3d   :  { %390 = vmatprep.subr.bf16.mxu1 %v389_v4  ;;  %v87_v33 = vld [vmem:[#allocation5 + $0x178] sm:$0xff]  ;;  %v367_v34 = vpack.c.bf16 %v55_v30, %v54_v29 }
  0x3e   :  { %v399_v35 = vpack.c.bf16 %v87_v33, %v86_v32 }
  0x3f   :  { %360 = vmatpush3.bf16.msra.mxu0 %v359_v10 }
  0x40   :  { %392 = vmatpush3.bf16.msra.mxu1 %v391_v13  ;;  %362 = vmatprep.subr.bf16.mxu0 %v361_v14 }
  0x41   :  { %394 = vmatprep.subr.bf16.mxu1 %v393_v18 }
  0x43   :  { %364 = vmatpush3.bf16.msra.mxu0 %v363_v26 }
  0x44   :  { %396 = vmatpush3.bf16.msra.mxu1 %v395_v27  ;;  %366 = vmatprep.subr.bf16.mxu0 %v365_v28 }
  0x45   :  { %398 = vmatprep.subr.bf16.mxu1 %v397_v31 }
  0x47   :  { %368 = vmatpush3.bf16.msra.mxu0 %v367_v34 }
  0x48   :  { %400 = vmatpush3.bf16.msra.mxu1 %v399_v35 }
  0x4a   :  { %175 = vmatmul.mubr.f32.vlgmr.msra.gmra.mrb[0].mxu0 %v38_v16 }
  0x4b   :  { %245 = vmatmul.mubr.f32.vlgmr.msra.gmra.mrb[0].mxu1 %v39_v17 }
 0x11d   :  { %v299_v36 = vpop.f32.mrb[0].mxu0 }
 0x11e   :  { %v334_v37 = vpop.f32.mrb[0].mxu1  ;;  %v300_v38 = vpop.f32.mrb[1].mxu0 }
 0x11f   :  { %v301_v39 = vadd.f32 %v300_v38, %v299_v36  ;;  %v335_v40 = vpop.f32.mrb[1].mxu1 }
 0x120   :  { %v336_v41 = vadd.f32 %v335_v40, %v334_v37 }
 0x122   :  { %v247_v42 = vadd.f32 %v336_v41, %v301_v39 }
 0x124   :  { %250 = vst [vmem:[#allocation7] sm:$0xf] %v247_v42 }
 0x125   :  { %463 = shalt.err (!%p460_p6)
}
 0x126   :  { %s464_s10 = scalar_lea.hbm %s545_s2, 64 }
 0x127   :  { %p465_p7 = scmp.ne.s32.totalorder %s545_s2, %s464_s10  ;;  %p468_p8 = scmp.lt.u32.totalorder %s464_s10, %s545_s2 }
 0x129   :  { %p470_p9 = pnand %p468_p8, %p465_p7 }
 0x12b   :  { %473 = shalt.err (!%p470_p9)
}
 0x12c   :  { %260 = dma.vmem_to_hbm [thread:$0]  %s258_s6, 64, %s545_s2, [#allocation4]  }
 0x12d   :  { %478 = dma.done.wait [#allocation4], 64  }
 0x12e   :  { %479 = vsyncadd [#allocation4], 4294967232 }
 0x12f   :  { %264 = vsyncpa [#allocation3], 1 }
 0x130   :  { %265 = vsyncpa [#allocation6], 1 }
 0x131   :  { %266 = vsyncpa [#allocation4], 1 }

</bundles_post_ra>
